<compile_context>
chip_gen: v7x
topology: tpu7x:2x2x1
jax: 0.10.0
libtpu: 0.0.40
codegen_flags: <defaults>
</compile_context>

<pallas_src>
import math
import jax
import jax.numpy as jnp
from jax import lax
from jax.experimental import pallas as pl
from jax.experimental.pallas import tpu as pltpu

# Rows of obs per grid step. Multiple of 128 (lane-dense output block stays legal for
# multi-tile grids).  Sweep 4096-16384 per generation size; 8192 keeps the per-step
# working set ~5 MiB, safe on v7x's 64 MiB VMEM without raising vmem_limit_bytes.
TILE_B_MAX = 8192


# ----------------------------- Pallas kernel ------------------------------- #
def critic_mlp_kernel(x_ref, w1_ref, b1_ref, w2_ref, b2_ref, w3t_ref, b3t_ref, o_ref):
    # x:   (TB, in)   f32 (streamed per tile; cast to bf16 here, once)
    # w1:  (in, hid)  bf16   b1:  (1, hid)  f32     (params VMEM-resident)
    # w2:  (hid, hid) bf16   b2:  (1, hid)  f32
    # w3t: (out, hid) bf16   b3t: (out, 1)  f32
    # o:   (out, TB)  f32    lane-dense output block (batch on the lane axis)
    x = x_ref[...].astype(jnp.bfloat16)                          # single cheap vcvt
    h1 = jnp.dot(x, w1_ref[...], preferred_element_type=jnp.float32) + b1_ref[...]
    h1 = jnp.maximum(h1, 0.0)                                    # ReLU, f32 VPU
    h2 = jnp.dot(h1.astype(jnp.bfloat16), w2_ref[...],
                 preferred_element_type=jnp.float32) + b2_ref[...]
    h2 = jnp.maximum(h2, 0.0)                                    # ReLU, f32 VPU
    # Lane-dense last layer: (out, TB) = w3t (out, hid) . h2 (TB, hid), contracting on
    # the hidden dim of both operands -> no materialized (TB, hid) transpose temp.
    out_t = lax.dot_general(
        w3t_ref[...], h2.astype(jnp.bfloat16),
        dimension_numbers=(((1,), (1,)), ((), ())),
        preferred_element_type=jnp.float32,
    ) + b3t_ref[...]
    o_ref[...] = out_t


# --------------------------------- wrapper ---------------------------------- #
def prepare_params(params):
    """One-time (per optimizer update) parameter prep, hoisted out of the hot path:
    bf16 weight casts, w3 transpose, f32 bias layout for the lane-dense output."""
    return dict(
        w1=params["w1"].astype(jnp.bfloat16),                 # (in, hid)
        b1=params["b1"].reshape(1, -1).astype(jnp.float32),   # (1, hid)
        w2=params["w2"].astype(jnp.bfloat16),                 # (hid, hid)
        b2=params["b2"].reshape(1, -1).astype(jnp.float32),   # (1, hid)
        w3t=params["w3"].T.astype(jnp.bfloat16),              # (out, hid)
        b3t=params["b3"].reshape(1, -1).T.astype(jnp.float32),  # (out, 1)
    )


def critic_forward(obs, prepped, tile_b_max=TILE_B_MAX):
    """obs: (B, in_dim) float32. prepped: output of prepare_params.
    Returns (B, out_dim) float32."""
    obs = obs.astype(jnp.float32)            # matches torch forward's f32 contract
    B, in_dim = obs.shape
    w1, b1 = prepped["w1"], prepped["b1"]
    w2, b2 = prepped["w2"], prepped["b2"]
    w3t, b3t = prepped["w3t"], prepped["b3t"]
    hid = w1.shape[1]
    out_dim = w3t.shape[0]

    if B <= tile_b_max:
        tile_b, grid = B, 1                  # single step: block == full array dims
    else:
        tile_b = tile_b_max                  # multiple of 128; trailing block masked
        grid = pl.cdiv(B, tile_b)

    resident = lambda a: pl.BlockSpec(a.shape, lambda i: (0, 0))   # one DMA per call

    flops = 2 * B * (in_dim * hid + hid * hid + hid * out_dim)
    bytes_accessed = (
        B * in_dim * 4 + out_dim * B * 4
        + sum(int(a.size) * a.dtype.itemsize for a in (w1, b1, w2, b2, w3t, b3t))
    )

    out_t = pl.pallas_call(
        critic_mlp_kernel,
        out_shape=jax.ShapeDtypeStruct((out_dim, B), jnp.float32),
        grid=(grid,),
        in_specs=[
            pl.BlockSpec((tile_b, in_dim), lambda i: (i, 0)),      # streamed f32 obs
            resident(w1), resident(b1),
            resident(w2), resident(b2),
            resident(w3t), resident(b3t),
        ],
        out_specs=pl.BlockSpec((out_dim, tile_b), lambda i: (0, i)),  # lane-dense
        compiler_params=pltpu.CompilerParams(
            dimension_semantics=("parallel",),   # v7x: batch tiles across its 2 TCs
        ),
        cost_estimate=pl.CostEstimate(
            flops=flops, transcendentals=0, bytes_accessed=bytes_accessed),
    )(obs, w1, b1, w2, b2, w3t, b3t)

    # Padded/garbage columns (rows >= B from the masked trailing block) are discarded
    # here and never read anywhere else.
    return out_t.T[:B]


# -------------------- reference (mirrors the kernel dtype path) -------------- #
def critic_reference(obs, prepped):
    x = obs.astype(jnp.float32).astype(jnp.bfloat16)
    h1 = jnp.maximum(
        jnp.dot(x, prepped["w1"], preferred_element_type=jnp.float32) + prepped["b1"], 0.0)
    h2 = jnp.maximum(
        jnp.dot(h1.astype(jnp.bfloat16), prepped["w2"],
                preferred_element_type=jnp.float32) + prepped["b2"], 0.0)
    out = jnp.dot(h2.astype(jnp.bfloat16), prepped["w3t"].T,
                  preferred_element_type=jnp.float32) + prepped["b3t"].T
    return out


# ------------------------- deterministic init glue -------------------------- #
def orthogonal_(key, rows, cols, std):
    """Mimic torch.nn.init.orthogonal_ (QR of a Gaussian), scaled by std."""
    a = jax.random.normal(key, (max(rows, cols), min(rows, cols)), dtype=jnp.float32)
    q, r = jnp.linalg.qr(a)
    d = jnp.sign(jnp.diag(r))
    d = jnp.where(d == 0, 1.0, d)
    q = q * d
    if rows < cols:
        q = q.T
    return std * q[:rows, :cols]


def init_critic_params(key, in_dim, hidden_dim, out_dim):
    k1, k2, k3 = jax.random.split(key, 3)
    std = math.sqrt(2.0)
    # PyTorch Linear weight is (out, in); orthogonal init applied to that shape,
    # then transposed to (in, out) for the kernel's x @ W convention.
    w1 = orthogonal_(k1, hidden_dim, in_dim, std).T        # (in_dim, hidden)
    w2 = orthogonal_(k2, hidden_dim, hidden_dim, std).T    # (hidden, hidden)
    w3 = orthogonal_(k3, out_dim, hidden_dim, 1.0).T       # (hidden, out_dim)
    return dict(
        w1=w1, b1=jnp.zeros((1, hidden_dim), jnp.float32),
        w2=w2, b2=jnp.zeros((1, hidden_dim), jnp.float32),
        w3=w3, b3=jnp.zeros((1, out_dim), jnp.float32),
    )


# ----------------------------------- main ----------------------------------- #
if __name__ == "__main__":
    in_dim, hidden_dim, out_dim = 16, 32, 1
    batch = 8

    key = jax.random.PRNGKey(0)
    k_obs, k_params, k_big = jax.random.split(key, 3)

    obs = jax.random.normal(k_obs, (batch, in_dim), dtype=jnp.float32)
    params = init_critic_params(k_params, in_dim, hidden_dim, out_dim)
    prepped = prepare_params(params)          # one-time prep, hoisted from hot path

    # Small case: single grid step, block == full array dims.
    value = critic_forward(obs, prepped)
    jax.block_until_ready(value)
    assert value.shape == (batch, out_dim)
    ref = critic_reference(obs, prepped)
    assert jnp.allclose(value, ref, atol=2e-3, rtol=2e-3)

    # Multi-tile path with a ragged trailing block: tile 1024 over B=2600 -> grid=3.
    big_b = 2600
    obs_big = jax.random.normal(k_big, (big_b, in_dim), dtype=jnp.float32)
    value_big = critic_forward(obs_big, prepped, tile_b_max=1024)
    jax.block_until_ready(value_big)
    assert value_big.shape == (big_b, out_dim)
    ref_big = critic_reference(obs_big, prepped)
    assert jnp.allclose(value_big, ref_big, atol=2e-3, rtol=2e-3)

    print("KERNEL_OK")
</pallas_src>

<mosaic_0001>
module attributes {stable_mosaic.version = 11 : i64} {
  func.func @critic_mlp_kernel(%arg0: i32, %arg1: memref<8x16xf32, #tpu.memory_space<vmem>>, %arg2: memref<16x32xbf16, #tpu.memory_space<vmem>>, %arg3: memref<1x32xf32, #tpu.memory_space<vmem>>, %arg4: memref<32x32xbf16, #tpu.memory_space<vmem>>, %arg5: memref<1x32xf32, #tpu.memory_space<vmem>>, %arg6: memref<1x32xbf16, #tpu.memory_space<vmem>>, %arg7: memref<1x1xf32, #tpu.memory_space<vmem>>, %arg8: memref<1x8xf32, #tpu.memory_space<vmem>>) attributes {dimension_semantics = [#tpu.dimension_semantics<parallel>], iteration_bounds = array<i64: 1>, scalar_prefetch = 0 : i64, scratch_operands = 0 : i64, tpu.core_type = #tpu.core_type<tc>, window_params = [{transform_indices = @transform_0, window_bounds = array<i64: 8, 16>}, {pipeline_mode = #tpu.pipeline_mode<synchronous>, transform_indices = @transform_1, window_bounds = array<i64: 16, 32>}, {pipeline_mode = #tpu.pipeline_mode<synchronous>, transform_indices = @transform_2, window_bounds = array<i64: 1, 32>}, {pipeline_mode = #tpu.pipeline_mode<synchronous>, transform_indices = @transform_3, window_bounds = array<i64: 32, 32>}, {pipeline_mode = #tpu.pipeline_mode<synchronous>, transform_indices = @transform_4, window_bounds = array<i64: 1, 32>}, {pipeline_mode = #tpu.pipeline_mode<synchronous>, transform_indices = @transform_5, window_bounds = array<i64: 1, 32>}, {pipeline_mode = #tpu.pipeline_mode<synchronous>, transform_indices = @transform_6, window_bounds = array<i64: 1, 1>}, {transform_indices = @transform_7, window_bounds = array<i64: 1, 8>}]} {
    %c0 = arith.constant 0 : index
    %c0_0 = arith.constant 0 : index
    %0 = vector.load %arg1[%c0, %c0_0] : memref<8x16xf32, #tpu.memory_space<vmem>>, vector<8x16xf32>
    %1 = arith.truncf %0 : vector<8x16xf32> to vector<8x16xbf16>
    %c0_1 = arith.constant 0 : index
    %c0_2 = arith.constant 0 : index
    %2 = vector.load %arg2[%c0_1, %c0_2] : memref<16x32xbf16, #tpu.memory_space<vmem>>, vector<16x32xbf16>
    %cst = arith.constant dense<0.000000e+00> : vector<8x32xf32>
    %3 = tpu.matmul %1, %2, %cst {dimension_numbers = #tpu.dot_dimension_numbers<[1], [0], [0], [1], [0, 0, 1, 1], [], []>} : vector<8x16xbf16>, vector<16x32xbf16>, vector<8x32xf32> -> vector<8x32xf32>
    %c0_3 = arith.constant 0 : index
    %c0_4 = arith.constant 0 : index
    %4 = vector.load %arg3[%c0_3, %c0_4] : memref<1x32xf32, #tpu.memory_space<vmem>>, vector<1x32xf32>
    %5 = vector.broadcast %4 : vector<1x32xf32> to vector<8x32xf32>
    %6 = arith.addf %3, %5 : vector<8x32xf32>
    %cst_5 = arith.constant 0.000000e+00 : f32
    %7 = vector.broadcast %cst_5 : f32 to vector<8x32xf32>
    %8 = arith.maximumf %6, %7 : vector<8x32xf32>
    %9 = arith.truncf %8 : vector<8x32xf32> to vector<8x32xbf16>
    %c0_6 = arith.constant 0 : index
    %c0_7 = arith.constant 0 : index
    %10 = vector.load %arg4[%c0_6, %c0_7] : memref<32x32xbf16, #tpu.memory_space<vmem>>, vector<32x32xbf16>
    %cst_8 = arith.constant dense<0.000000e+00> : vector<8x32xf32>
    %11 = tpu.matmul %9, %10, %cst_8 {dimension_numbers = #tpu.dot_dimension_numbers<[1], [0], [0], [1], [0, 0, 1, 1], [], []>} : vector<8x32xbf16>, vector<32x32xbf16>, vector<8x32xf32> -> vector<8x32xf32>
    %c0_9 = arith.constant 0 : index
    %c0_10 = arith.constant 0 : index
    %12 = vector.load %arg5[%c0_9, %c0_10] : memref<1x32xf32, #tpu.memory_space<vmem>>, vector<1x32xf32>
    %13 = vector.broadcast %12 : vector<1x32xf32> to vector<8x32xf32>
    %14 = arith.addf %11, %13 : vector<8x32xf32>
    %cst_11 = arith.constant 0.000000e+00 : f32
    %15 = vector.broadcast %cst_11 : f32 to vector<8x32xf32>
    %16 = arith.maximumf %14, %15 : vector<8x32xf32>
    %c0_12 = arith.constant 0 : index
    %c0_13 = arith.constant 0 : index
    %17 = vector.load %arg6[%c0_12, %c0_13] : memref<1x32xbf16, #tpu.memory_space<vmem>>, vector<1x32xbf16>
    %18 = arith.truncf %16 : vector<8x32xf32> to vector<8x32xbf16>
    %cst_14 = arith.constant dense<0.000000e+00> : vector<1x8xf32>
    %19 = tpu.matmul %17, %18, %cst_14 {dimension_numbers = #tpu.dot_dimension_numbers<[1], [1], [0], [0], [0, 0, 1, 0], [], []>} : vector<1x32xbf16>, vector<8x32xbf16>, vector<1x8xf32> -> vector<1x8xf32>
    %c0_15 = arith.constant 0 : index
    %c0_16 = arith.constant 0 : index
    %20 = vector.load %arg7[%c0_15, %c0_16] : memref<1x1xf32, #tpu.memory_space<vmem>>, vector<1x1xf32>
    %21 = vector.broadcast %20 : vector<1x1xf32> to vector<1x8xf32>
    %22 = arith.addf %19, %21 : vector<1x8xf32>
    %c0_17 = arith.constant 0 : index
    %c0_18 = arith.constant 0 : index
    %23 = vector.load %arg8[%c0_17, %c0_18] : memref<1x8xf32, #tpu.memory_space<vmem>>, vector<1x8xf32>
    tpu.vector_store %arg8[%c0_17, %c0_18], %22 {strides = array<i32>} : memref<1x8xf32, #tpu.memory_space<vmem>>, vector<1x8xf32>,
    return
  }
  func.func @transform_0(%arg0: i32) -> (i32, i32) {
    %c0_i32 = arith.constant 0 : i32
    %c0_i32_0 = arith.constant 0 : i32
    return %arg0, %c0_i32 : i32, i32
  }
  func.func @transform_1(%arg0: i32) -> (i32, i32) {
    %c0_i32 = arith.constant 0 : i32
    %c0_i32_0 = arith.constant 0 : i32
    %c0_i32_1 = arith.constant 0 : i32
    return %c0_i32, %c0_i32_0 : i32, i32
  }
  func.func @transform_2(%arg0: i32) -> (i32, i32) {
    %c0_i32 = arith.constant 0 : i32
    %c0_i32_0 = arith.constant 0 : i32
    %c0_i32_1 = arith.constant 0 : i32
    return %c0_i32, %c0_i32_0 : i32, i32
  }
  func.func @transform_3(%arg0: i32) -> (i32, i32) {
    %c0_i32 = arith.constant 0 : i32
    %c0_i32_0 = arith.constant 0 : i32
    %c0_i32_1 = arith.constant 0 : i32
    return %c0_i32, %c0_i32_0 : i32, i32
  }
  func.func @transform_4(%arg0: i32) -> (i32, i32) {
    %c0_i32 = arith.constant 0 : i32
    %c0_i32_0 = arith.constant 0 : i32
    %c0_i32_1 = arith.constant 0 : i32
    return %c0_i32, %c0_i32_0 : i32, i32
  }
  func.func @transform_5(%arg0: i32) -> (i32, i32) {
    %c0_i32 = arith.constant 0 : i32
    %c0_i32_0 = arith.constant 0 : i32
    %c0_i32_1 = arith.constant 0 : i32
    return %c0_i32, %c0_i32_0 : i32, i32
  }
  func.func @transform_6(%arg0: i32) -> (i32, i32) {
    %c0_i32 = arith.constant 0 : i32
    %c0_i32_0 = arith.constant 0 : i32
    %c0_i32_1 = arith.constant 0 : i32
    return %c0_i32, %c0_i32_0 : i32, i32
  }
  func.func @transform_7(%arg0: i32) -> (i32, i32) {
    %c0_i32 = arith.constant 0 : i32
    %c0_i32_0 = arith.constant 0 : i32
    return %c0_i32, %arg0 : i32, i32
  }
}

</mosaic_0001>

<bundles_post_ra>
// kernel: tpu_custom_call.1
= control target key start
LH: loop header
LB: loop body
LE: loop exit
PB: predicated region body
PF: predicated region fallthrough
CT: control target
= control target key end

     0   :  { %s536_s0 = inlined_call_operand.hbm [shape: f32[8,16], index: 0, kind: input, shape index: {}]   ;;  %s537_s1 = inlined_call_operand.hbm [shape: bf16[16,32], index: 1, kind: input, shape index: {}]   ;;  %s538_s2 = inlined_call_operand.vmem [shape: f32[1,32], index: 2, kind: input, shape index: {}]   ;;  %s539_s3 = inlined_call_operand.hbm [shape: bf16[32,32], index: 3, kind: input, shape index: {}]   ;;  %s540_s4 = inlined_call_operand.vmem [shape: f32[1,32], index: 4, kind: input, shape index: {}]   ;;  %s541_s5 = inlined_call_operand.vmem [shape: bf16[1,32], index: 5, kind: input, shape index: {}]   ;;  %s542_s6 = inlined_call_operand.<no memory space> [shape: f32[1,1], index: 6, kind: input, shape index: {}]   ;;  %s543_s7 = inlined_call_operand.hbm [shape: f32[1,8], index: 7, kind: output, shape index: {}]  }
   0x1   :  { %v12_v0 = vstv %s542_s6 }
   0x2   :  { %13 = vst [vmem:[#allocation2] sm:$0x1] %v12_v0 }
   0x3   :  { %14 = vsyncpa [#allocation4], 0 }
   0x4   :  { %15 = vsyncpa [#allocation7], 0 }
   0x5   :  { %16 = vsyncpa [#allocation5], 0  ;;  %s418_s26 = smov [#allocation6]   ;;  %s324_s30 = scalar_lea.hbm %s537_s1, 128 }
   0x6   :  { %s32_s27 = sshll.u32 %s418_s26, 4  ;;  %p325_p0 = scmp.ne.s32.totalorder %s537_s1, %s324_s30  ;;  %s33_s27 = int_to_ptr.vmem [resolvable:$true] %s32_s27 }
   0x7   :  { %p328_p1 = scmp.lt.u32.totalorder %s324_s30, %s537_s1 }
   0x9   :  { %p330_p2 = pnand %p328_p1, %p325_p0 }
   0xb   :  { %333 = shalt.err (!%p330_p2)
}
   0xc   :  { %s334_s6 = scalar_lea.vmem %s33_s27, 128  ;;  %p339_p4 = scmp.lt.s32.totalorder %s33_s27, %s33_s27 }
   0xd   :  { %p335_p3 = scmp.ne.s32.totalorder %s33_s27, %s334_s6  ;;  %p340_p5 = scmp.lt.s32.totalorder %s334_s6, %s334_s6 }
   0xf   :  { %p341_p6 = por %p340_p5, %p339_p4 }
  0x11   :  { %p342_p7 = pnand %p341_p6, %p335_p3 }
  0x13   :  { %345 = shalt.err (!%p342_p7)
}
  0x14   :  { %s419_s12 = smov 64   ;;  %s420_s13 = smov 4  }
  0x15   :  { %38 = dma.hbm_to_vmem [thread:$0]  %s537_s1, 128, %s33_s27, [#allocation7], %s419_s12, %s419_s12, %s420_s13  }
  0x16   :  { %s421_s16 = smov [#allocation3]   ;;  %s422_s18 = smov [#allocation8]  }
  0x17   :  { %s23_s17 = sshll.u32 %s421_s16, 4  ;;  %s46_s19 = sshll.u32 %s422_s18, 4  ;;  %s24_s17 = int_to_ptr.vmem [resolvable:$true] %s23_s17  ;;  %s47_s19 = int_to_ptr.vmem [resolvable:$true] %s46_s19 }
  0x18   :  { %s346_s22 = scalar_lea.hbm %s536_s0, 128 }
  0x19   :  { %p347_p8 = scmp.ne.s32.totalorder %s536_s0, %s346_s22  ;;  %p350_p9 = scmp.lt.u32.totalorder %s346_s22, %s536_s0 }
  0x1b   :  { %p352_p10 = pnand %p350_p9, %p347_p8 }
  0x1d   :  { %355 = shalt.err (!%p352_p10)
}
  0x1e   :  { %s356_s1 = scalar_lea.vmem %s24_s17, 128  ;;  %p361_p12 = scmp.lt.s32.totalorder %s24_s17, %s24_s17 }
  0x1f   :  { %p357_p11 = scmp.ne.s32.totalorder %s24_s17, %s356_s1  ;;  %p362_p13 = scmp.lt.s32.totalorder %s356_s1, %s356_s1 }
  0x21   :  { %p363_p0 = por %p362_p13, %p361_p12 }
  0x23   :  { %p364_p1 = pnand %p363_p0, %p357_p11 }
  0x25   :  { %367 = shalt.err (!%p364_p1)
}
  0x26   :  { %26 = dma.hbm_to_vmem [thread:$0]  %s536_s0, 128, %s24_s17, [#allocation4]  }
  0x27   :  { %s368_s8 = scalar_lea.hbm %s539_s3, 256 }
  0x28   :  { %p369_p2 = scmp.ne.s32.totalorder %s539_s3, %s368_s8  ;;  %p372_p3 = scmp.lt.u32.totalorder %s368_s8, %s539_s3 }
  0x2a   :  { %p374_p4 = pnand %p372_p3, %p369_p2 }
  0x2c   :  { %377 = shalt.err (!%p374_p4)
}
  0x2d   :  { %s378_s14 = scalar_lea.vmem %s47_s19, 256  ;;  %p383_p6 = scmp.lt.s32.totalorder %s47_s19, %s47_s19 }
  0x2e   :  { %p379_p5 = scmp.ne.s32.totalorder %s47_s19, %s378_s14  ;;  %p384_p7 = scmp.lt.s32.totalorder %s378_s14, %s378_s14 }
  0x30   :  { %p385_p8 = por %p384_p7, %p383_p6 }
  0x32   :  { %p386_p9 = pnand %p385_p8, %p379_p5 }
  0x34   :  { %389 = shalt.err (!%p386_p9)
}
  0x35   :  { %52 = dma.hbm_to_vmem [thread:$0]  %s539_s3, 256, %s47_s19, [#allocation7], %s419_s12, %s419_s12, %s420_s13  }
  0x36   :  { %412 = dma.done.wait [#allocation4], 128  }
  0x37   :  { %413 = vsyncadd [#allocation4], 4294967168 }
  0x38   :  { %414 = dma.done.wait [#allocation7], 384  }
  0x39   :  { %415 = vsyncadd [#allocation7], 4294966912  ;;  %v423_v1 = vmov 0.0   ;;  %vm424_vm0 = vmmov 0   ;;  %v321_v2 = vld [vmem:[#allocation6] sm:$0xff]   ;;  %v69_v3 = vld [vmem:[#allocation3] sm:$0xff]  ;;  %v208_v27 = vlaneseq }
  0x3a   :  { %291 = vmatprep.subr.bf16.mxu0 %v423_v1  ;;  %293 = vmatprep.mubr.msk.bf16.mxu0 %vm424_vm0, %v423_v1  ;;  %vm86_vm1 = vcmask 130048   ;;  %v70_v4 = vpack.c.bf16 %v69_v3, %v69_v3  ;;  %v322_v5 = vld [vmem:[#allocation8] sm:$0xff]   ;;  %v323_v6 = vld [vmem:[#allocation8 + $0x8] sm:$0xff]   ;;  %vm155_vm2 = vcmask 261120   ;;  %v425_v16 = vmov 0  }
  0x3b   :  { %297 = vmatprep.subr.bf16.mxu1 %v423_v1  ;;  %301 = vmatprep.mubr.msk.bf16.mxu1 %vm424_vm0, %v423_v1  ;;  %v276_v7 = vld [vmem:[%s538_s2] ss:$0 sm:$0xff]  ;;  %v209_v28 = vshrl.u32 %v208_v27, 7  ;;  %vm258_vm3 = vcmask 57344  }
  0x3c   :  { %292 = vmatpush3.bf16.msra.mxu0 %v321_v2  ;;  %298 = vmatpush3.bf16.msra.mxu1 %v322_v5  ;;  %v202_v15 = vld [vmem:[#allocation2] sm:$0x1] }
  0x3d   :  { %305 = vmatprep.subr.bf16.mxu0 %v423_v1  ;;  %299 = vmatprep.subr.bf16.mxu1 %v423_v1  ;;  %v279_v17 = vld [vmem:[%s540_s4] ss:$0 sm:$0xff]  ;;  %v210_v29 = vsub.s32 0, %v209_v28  ;;  %s426_s4 = smov [#allocation9]  }
  0x3e   :  { %320 = vset.pattern.permute.xlu0 %v425_v16  ;;  %v200_v26 = vld [vmem:[%s541_s5] sm:$0x1]  ;;  %s266_s18 = sshll.u32 %s426_s4, 4  ;;  %s267_s18 = int_to_ptr.vmem [resolvable:$true] %s266_s18 }
  0x3f   :  { %294 = vmatmul.mubr.msk.bf16.vlgmr.msra.gmra.mrb[0].mxu0 %vm86_vm1, %v70_v4  ;;  %205 = vperm.xlu0 %320, %v202_v15   ;;  %s390_s19 = scalar_lea.vmem %s267_s18, 16  ;;  %s394_s5 = scalar_lea.vmem %s267_s18, 32 }
  0x40   :  { %307 = vmatprep.mubr.msk.bf16.mxu0 %vm424_vm0, %v423_v1  ;;  %300 = vmatpush3.bf16.msra.mxu1 %v323_v6  ;;  %p391_p10 = scmp.ne.s32.totalorder %s267_s18, %s390_s19  ;;  %p395_p11 = scmp.lt.s32.totalorder %s267_s18, %s267_s18 }
  0x41   :  { %p396_p12 = scmp.lt.s32.totalorder %s394_s5, %s390_s19 }
  0x43   :  { %p397_p13 = por %p396_p12, %p395_p11 }
  0x45   :  { %p398_p0 = pnand %p397_p13, %p391_p10 }
  0xbe   :  { %v206_v30 = vpop.permute.xlu0 %205 }
  0xbf   :  { %v211_v31 = vrot.slane %v206_v30, %v210_v29 }
 0x112   :  { %v124_v8 = vpop.f32.mrb[0].mxu0 }
 0x113   :  { %v125_v9 = vadd.f32 %v276_v7, %v124_v8  ;;  %v295_v10 = vpop.f32.mrb[1].mxu0 }
 0x114   :  { %v127_v11 = vpop.f32.mrb[2].mxu0 }
 0x115   :  { %v130_v12 = vmax.f32 %v125_v9, 0.0  ;;  %v296_v13 = vpop.f32.mrb[3].mxu0 }
 0x117   :  { %v131_v14 = vpack.c.bf16 %v130_v12, %v130_v12 }
 0x119   :  { %302 = vmatmul.mubr.msk.bf16.vlgmr.msra.gmra.mrb[0].mxu1 %vm155_vm2, %v131_v14 }
 0x1ec   :  { %v193_v18 = vpop.f32.mrb[0].mxu1 }
 0x1ed   :  { %v194_v19 = vadd.f32 %v279_v17, %v193_v18  ;;  %v303_v20 = vpop.f32.mrb[1].mxu1 }
 0x1ee   :  { %v196_v21 = vpop.f32.mrb[2].mxu1 }
 0x1ef   :  { %v199_v22 = vmax.f32 %v194_v19, 0.0  ;;  %v304_v23 = vpop.f32.mrb[3].mxu1 }
 0x1f1   :  { %v201_v24 = vpack.c.bf16 %v199_v22, %v199_v22 }
 0x1f3   :  { %v216_v25 = vsel %vm155_vm2, %v201_v24, 0 }
 0x1f4   :  { %306 = vmatpush3.bf16.xpose.msra.mxu0 %v216_v25 }
 0x1fb   :  { %308 = vmatmul.mubr.msk.bf16.vlgmr.msra.gmra.mrb[4].mxu0 %vm155_vm2, %v200_v26 }
 0x2ce   :  { %v252_v32 = vpop.f32.mrb[4].mxu0 }
 0x2cf   :  { %v253_v33 = vadd.f32 %v252_v32, %v211_v31  ;;  %v309_v34 = vpop.f32.mrb[5].mxu0 }
 0x2d0   :  { %v255_v35 = vpop.f32.mrb[6].mxu0 }
 0x2d1   :  { %v310_v36 = vpop.f32.mrb[7].mxu0  ;;  %259 = vst.msk [vmem:[#allocation9] sm:$0x1] %vm258_vm3, %v253_v33 }
 0x2d2   :  { %401 = shalt.err (!%p398_p0)
}
 0x2d3   :  { %s402_s22 = scalar_lea.hbm %s543_s7, 16 }
 0x2d4   :  { %p403_p1 = scmp.ne.s32.totalorder %s543_s7, %s402_s22  ;;  %p406_p2 = scmp.lt.u32.totalorder %s402_s22, %s543_s7 }
 0x2d6   :  { %p408_p3 = pnand %p406_p2, %p403_p1 }
 0x2d8   :  { %411 = shalt.err (!%p408_p3)
}
 0x2d9   :  { %269 = dma.vmem_to_hbm [thread:$0]  %s267_s18, 16, %s543_s7, [#allocation5]  }
 0x2da   :  { %416 = dma.done.wait [#allocation5], 16  }
 0x2db   :  { %417 = vsyncadd [#allocation5], 4294967280 }
 0x2dc   :  { %273 = vsyncpa [#allocation4], 1 }
 0x2dd   :  { %274 = vsyncpa [#allocation7], 1 }
 0x2de   :  { %275 = vsyncpa [#allocation5], 1 }

</bundles_post_ra>
